<compile_context>
chip_gen: v7x
topology: tpu7x:2x2x1
jax: 0.10.0
libtpu: 0.0.40
codegen_flags: <defaults>
</compile_context>

<pallas_src>
import math
import re

import jax
import jax.numpy as jnp
from jax.experimental import pallas as pl
from jax.experimental.pallas import tpu as pltpu

_LANE = 128                      # vreg lane width (last dim)
_MIN_PALLAS_BYTES = 1 << 20      # below this, plain jnp is faster (launch overhead)


def _cdiv(a, b):
    return -(-a // b)


def _tpu_generation():
    """Best-effort TPU generation (5, 6, 7, ...) from device_kind; 0 if unknown."""
    try:
        kind = jax.devices()[0].device_kind.lower()
    except Exception:
        return 0
    m = re.search(r"v(\d+)", kind)
    return int(m.group(1)) if m else 0


def _drop_path_kernel_native(x_ref, scale_ref, o_ref):
    # scale is already in x.dtype: single vld/vmul/vst stream, no f32 round-trip.
    o_ref[...] = x_ref[...] * scale_ref[...]


def _drop_path_kernel_f32(x_ref, scale_ref, o_ref):
    # Upcast path (f32 accumulate) for v5e sub-32-bit inputs / non-float dtypes.
    o_ref[...] = (x_ref[...].astype(jnp.float32) * scale_ref[...]).astype(o_ref.dtype)


def _pick_block(n, feat, itemsize, gen):
    """Pick (bn, bf) for the (N, F) grid.

    Prefers full-F blocks (contiguous HBM DMA, no masked edge stores); rows are
    rounded to the dtype-specific packed sublane count.  Block budget is
    generation-aware: ~4 MiB on v7x (3.2 TB/s HBM makes the ~0.35 us per-step
    overhead a >20% tax at 2 MiB), 2 MiB elsewhere.
    """
    max_block_bytes = 4 * 1024 * 1024 if gen >= 7 else 2 * 1024 * 1024
    sub = max(8, 32 // max(itemsize, 1))          # 8 fp32, 16 bf16, 32 int8/fp8

    # Full-F block whenever at least one packed-sublane group of rows fits.
    if feat * itemsize * sub <= max_block_bytes:
        bf = feat
    else:
        bf = (max_block_bytes // (sub * itemsize)) // _LANE * _LANE
        bf = max(min(bf, (feat // _LANE) * _LANE), _LANE)

    rows = max(max_block_bytes // max(bf * itemsize, 1), sub)
    if n <= rows:
        bn = n                                     # full-extent batch dim: always legal
    else:
        bn = max((rows // sub) * sub, sub)         # multiple of the packed sublane count

    # v7x has 2 TensorCores: make sure the (parallel) grid has >= 2 steps.
    if gen >= 7 and _cdiv(n, bn) * _cdiv(feat, bf) < 2 and n >= 2 * sub:
        bn = max((_cdiv(n, 2) // sub) * sub, sub)

    return bn, bf, max_block_bytes


def drop_path(x, drop_prob=0.0, training=False, *, key=None, force_pallas=False):
    """Pallas implementation of drop_path_f (per-sample stochastic depth)."""
    if drop_prob == 0.0 or not training:
        return x
    if not 0.0 <= drop_prob < 1.0:
        raise ValueError(f"drop_prob must be in [0, 1), got {drop_prob}")
    if key is None:
        # A silent fixed fallback key would reuse the identical mask every step.
        raise ValueError("drop_path(training=True) requires an explicit PRNG `key`.")

    keep_prob = 1.0 - float(drop_prob)
    n = x.shape[0]
    feat = math.prod(x.shape[1:]) if x.ndim > 1 else 1
    x_flat = x.reshape(n, feat)

    # Per-sample scale, computed once in float32:
    #   mask = floor(keep_prob + U[0,1)) in {0, 1};  scale = mask / keep_prob
    u = jax.random.uniform(key, (n, 1), dtype=jnp.float32)
    scale_f32 = jnp.floor(keep_prob + u) * jnp.float32(1.0 / keep_prob)

    itemsize = jnp.dtype(x.dtype).itemsize
    total_bytes = n * feat * itemsize

    # Small-input fallback: launch + pipeline prologue dominate; XLA fuses this fine.
    if total_bytes < _MIN_PALLAS_BYTES and not force_pallas:
        out = (x_flat.astype(jnp.float32) * scale_f32).astype(x.dtype)
        return out.reshape(x.shape)

    gen = _tpu_generation()
    bn, bf, block_budget = _pick_block(n, feat, itemsize, gen)
    grid = (_cdiv(n, bn), _cdiv(feat, bf))

    # Pick compute dtype: native multiply when the VPU supports it (f32 anywhere,
    # bf16/fp8 on v6e+); otherwise keep the f32 round-trip (e.g. bf16 on v5e).
    if x.dtype == jnp.float32:
        kernel, scale = _drop_path_kernel_native, scale_f32
    elif jnp.issubdtype(x.dtype, jnp.floating) and itemsize < 4 and gen >= 6:
        kernel, scale = _drop_path_kernel_native, scale_f32.astype(x.dtype)
    else:
        kernel, scale = _drop_path_kernel_f32, scale_f32

    # ~2x the live double-buffered footprint, clamped to generation-safe bounds.
    block_bytes = bn * bf * itemsize
    vmem_cap = (16 if gen == 5 else 32) * 1024 * 1024
    vmem_limit = int(min(max(8 * block_bytes, 16 * 1024 * 1024), vmem_cap))

    out_flat = pl.pallas_call(
        kernel,
        out_shape=jax.ShapeDtypeStruct((n, feat), x.dtype),
        grid=grid,
        in_specs=[
            pl.BlockSpec((bn, bf), lambda i, j: (i, j)),
            pl.BlockSpec((bn, 1), lambda i, j: (i, 0)),   # scale resident along F
        ],
        out_specs=pl.BlockSpec((bn, bf), lambda i, j: (i, j)),
        compiler_params=pltpu.CompilerParams(
            dimension_semantics=("parallel", "parallel"),
            vmem_limit_bytes=vmem_limit,
        ),
    )(x_flat, scale)

    return out_flat.reshape(x.shape)


class DropPath:
    """JAX/Pallas mirror of the PyTorch DropPath module."""

    def __init__(self, drop_prob=None):
        self.drop_prob = 0.0 if drop_prob is None else drop_prob
        self.training = True

    def __call__(self, x, *, key=None):
        return drop_path(x, self.drop_prob, self.training, key=key)


if __name__ == "__main__":
    key = jax.random.PRNGKey(0)
    kx, kmask, kx2, kmask2, kx3, kmask3, kx4, kmask4 = jax.random.split(key, 8)
    drop_prob = 0.25
    keep_prob = 1.0 - drop_prob

    # 1) Small NCHW input consistent with HFF residual branches -> jnp fallback path.
    x = jax.random.normal(kx, (2, 4, 16, 16), dtype=jnp.float32)
    module = DropPath(drop_prob=drop_prob)
    module.training = True
    out = module(x, key=kmask)
    jax.block_until_ready(out)
    u = jax.random.uniform(kmask, (2, 1), dtype=jnp.float32)
    mask = jnp.floor(keep_prob + u).reshape(2, 1, 1, 1)
    ref = x / keep_prob * mask
    assert out.shape == x.shape and out.dtype == x.dtype
    assert jnp.allclose(out, ref, rtol=1e-6, atol=1e-6), "mismatch vs reference (small)"

    # 2) Larger activation -> tiled Pallas path (f32).
    x2 = jax.random.normal(kx2, (16, 8, 32, 32), dtype=jnp.float32)   # 2 MiB
    out2 = drop_path(x2, drop_prob, True, key=kmask2)
    jax.block_until_ready(out2)
    u2 = jax.random.uniform(kmask2, (16, 1), dtype=jnp.float32)
    mask2 = jnp.floor(keep_prob + u2).reshape(16, 1, 1, 1)
    ref2 = x2 / keep_prob * mask2
    assert jnp.allclose(out2, ref2, rtol=1e-6, atol=1e-6), "mismatch vs reference (pallas f32)"

    # 3) Awkward F (C*H*W = 3136, not a multiple of 128) -> full-F block path.
    x3 = jax.random.normal(kx3, (8, 4, 28, 28), dtype=jnp.float32)
    out3 = drop_path(x3, drop_prob, True, key=kmask3, force_pallas=True)
    jax.block_until_ready(out3)
    u3 = jax.random.uniform(kmask3, (8, 1), dtype=jnp.float32)
    mask3 = jnp.floor(keep_prob + u3).reshape(8, 1, 1, 1)
    ref3 = x3 / keep_prob * mask3
    assert jnp.allclose(out3, ref3, rtol=1e-6, atol=1e-6), "mismatch vs reference (full-F)"

    # 4) bf16 activations -> native-dtype multiply on v6e+/f32 path on v5e.
    x4 = jax.random.normal(kx4, (16, 8, 32, 32), dtype=jnp.float32).astype(jnp.bfloat16)
    out4 = drop_path(x4, drop_prob, True, key=kmask4, force_pallas=True)
    jax.block_until_ready(out4)
    u4 = jax.random.uniform(kmask4, (16, 1), dtype=jnp.float32)
    scale4 = (jnp.floor(keep_prob + u4) / keep_prob).reshape(16, 1, 1, 1)
    ref4 = (x4.astype(jnp.float32) * scale4).astype(jnp.bfloat16)
    assert out4.dtype == jnp.bfloat16
    assert jnp.allclose(out4.astype(jnp.float32), ref4.astype(jnp.float32),
                        rtol=2e-2, atol=2e-2), "mismatch vs reference (bf16)"

    # 5) Eval mode / drop_prob=0 path returns x unchanged.
    module.training = False
    out_eval = module(x)
    jax.block_until_ready(out_eval)
    assert jnp.array_equal(out_eval, x)

    print("KERNEL_OK")
</pallas_src>

<mosaic_0001>
module attributes {stable_mosaic.version = 11 : i64} {
  func.func @_drop_path_kernel_native(%arg0: i32, %arg1: i32, %arg2: memref<8x3136xf32, #tpu.memory_space<vmem>>, %arg3: memref<8x1xf32, #tpu.memory_space<vmem>>, %arg4: memref<8x3136xf32, #tpu.memory_space<vmem>>) attributes {dimension_semantics = [#tpu.dimension_semantics<parallel>, #tpu.dimension_semantics<parallel>], iteration_bounds = array<i64: 1, 1>, scalar_prefetch = 0 : i64, scratch_operands = 0 : i64, tpu.core_type = #tpu.core_type<tc>, window_params = [{transform_indices = @transform_0, window_bounds = array<i64: 8, 3136>}, {transform_indices = @transform_1, window_bounds = array<i64: 8, 1>}, {transform_indices = @transform_2, window_bounds = array<i64: 8, 3136>}]} {
    %c0 = arith.constant 0 : index
    %c0_0 = arith.constant 0 : index
    %0 = vector.load %arg2[%c0, %c0_0] : memref<8x3136xf32, #tpu.memory_space<vmem>>, vector<8x3136xf32>
    %c0_1 = arith.constant 0 : index
    %c0_2 = arith.constant 0 : index
    %1 = vector.load %arg3[%c0_1, %c0_2] : memref<8x1xf32, #tpu.memory_space<vmem>>, vector<8x1xf32>
    %2 = vector.broadcast %1 : vector<8x1xf32> to vector<8x3136xf32>
    %3 = arith.mulf %0, %2 : vector<8x3136xf32>
    %c0_3 = arith.constant 0 : index
    %c0_4 = arith.constant 0 : index
    %4 = vector.load %arg4[%c0_3, %c0_4] : memref<8x3136xf32, #tpu.memory_space<vmem>>, vector<8x3136xf32>
    tpu.vector_store %arg4[%c0_3, %c0_4], %3 {strides = array<i32>} : memref<8x3136xf32, #tpu.memory_space<vmem>>, vector<8x3136xf32>,
    return
  }
  func.func @transform_0(%arg0: i32, %arg1: i32) -> (i32, i32) {
    %c0_i32 = arith.constant 0 : i32
    return %arg0, %arg1 : i32, i32
  }
  func.func @transform_1(%arg0: i32, %arg1: i32) -> (i32, i32) {
    %c0_i32 = arith.constant 0 : i32
    %c0_i32_0 = arith.constant 0 : i32
    return %arg0, %c0_i32 : i32, i32
  }
  func.func @transform_2(%arg0: i32, %arg1: i32) -> (i32, i32) {
    %c0_i32 = arith.constant 0 : i32
    return %arg0, %arg1 : i32, i32
  }
}

</mosaic_0001>

<bundles_post_ra>
// kernel: tpu_custom_call.1
= control target key start
LH: loop header
LB: loop body
LE: loop exit
PB: predicated region body
PF: predicated region fallthrough
CT: control target
= control target key end

     0   :  { %7 = vsyncpa [#allocation3], 0  ;;  %s219_s0 = inlined_call_operand.hbm [shape: f32[8,3136], index: 0, kind: input, shape index: {}]   ;;  %s220_s1 = inlined_call_operand.vmem [shape: f32[8,1], index: 1, kind: input, shape index: {}]   ;;  %s221_s2 = inlined_call_operand.hbm [shape: f32[8,3136], index: 2, kind: output, shape index: {}]  }
   0x1   :  { %8 = vsyncpa [#allocation4], 0  ;;  %s173_s9 = smov [#allocation2]   ;;  %s125_s13 = scalar_lea.hbm %s219_s0, 3200 }
   0x2   :  { %s15_s10 = sshll.u32 %s173_s9, 4  ;;  %p126_p0 = scmp.ne.s32.totalorder %s219_s0, %s125_s13  ;;  %s16_s10 = int_to_ptr.vmem [resolvable:$true] %s15_s10 }
   0x3   :  { %p129_p1 = scmp.lt.u32.totalorder %s125_s13, %s219_s0 }
   0x5   :  { %p131_p2 = pnand %p129_p1, %p126_p0 }
   0x7   :  { %134 = shalt.err (!%p131_p2)
}
   0x8   :  { %s135_s18 = scalar_lea.vmem %s16_s10, 3200  ;;  %p140_p4 = scmp.lt.s32.totalorder %s16_s10, %s16_s10 }
   0x9   :  { %p136_p3 = scmp.ne.s32.totalorder %s16_s10, %s135_s18  ;;  %p141_p5 = scmp.lt.s32.totalorder %s135_s18, %s135_s18 }
   0xb   :  { %p142_p6 = por %p141_p5, %p140_p4 }
   0xd   :  { %p143_p7 = pnand %p142_p6, %p136_p3 }
   0xf   :  { %146 = shalt.err (!%p143_p7)
}
  0x10   :  { %18 = dma.hbm_to_vmem [thread:$0]  %s219_s0, 3200, %s16_s10, [#allocation3]  }
  0x11   :  { %169 = dma.done.wait [#allocation3], 3200  }
  0x12   :  { %170 = vsyncadd [#allocation3], 4294964096  ;;  %v174_v0 = vmov 0   ;;  %v49_v1 = vld [vmem:[%s220_s1] sm:$0xff]  ;;  %v25_v3 = vld [vmem:[#allocation2 + $0x8] sm:$0xff]  ;;  %vm104_vm0 = vcmask 523264  }
  0x13   :  { %124 = vset.pattern.permute.xlu0 %v174_v0  ;;  %v24_v2 = vld [vmem:[#allocation2] sm:$0xff]  ;;  %v26_v4 = vld [vmem:[#allocation2 + $0x10] sm:$0xff]  ;;  %v27_v5 = vld [vmem:[#allocation2 + $0x18] sm:$0xff]  ;;  %s175_s0 = smov [#allocation5]  }
  0x14   :  { %52 = vperm.xlu0 %124, %v49_v1   ;;  %v28_v6 = vld [vmem:[#allocation2 + $0x20] sm:$0xff]  ;;  %v29_v7 = vld [vmem:[#allocation2 + $0x28] sm:$0xff]  ;;  %v30_v8 = vld [vmem:[#allocation2 + $0x30] sm:$0xff]  ;;  %s112_s1 = sshll.u32 %s175_s0, 4  ;;  %s113_s1 = int_to_ptr.vmem [resolvable:$true] %s112_s1 }
  0x15   :  { %v31_v9 = vld [vmem:[#allocation2 + $0x38] sm:$0xff]  ;;  %v32_v10 = vld [vmem:[#allocation2 + $0x40] sm:$0xff]  ;;  %v33_v11 = vld [vmem:[#allocation2 + $0x48] sm:$0xff]  ;;  %s147_s23 = scalar_lea.vmem %s113_s1, 3200  ;;  %p152_p9 = scmp.lt.s32.totalorder %s113_s1, %s113_s1 }
  0x16   :  { %v34_v12 = vld [vmem:[#allocation2 + $0x50] sm:$0xff]  ;;  %v35_v13 = vld [vmem:[#allocation2 + $0x58] sm:$0xff]  ;;  %v36_v15 = vld [vmem:[#allocation2 + $0x60] sm:$0xff]  ;;  %p148_p8 = scmp.ne.s32.totalorder %s113_s1, %s147_s23  ;;  %p153_p10 = scmp.lt.s32.totalorder %s147_s23, %s147_s23 }
  0x17   :  { %v37_v16 = vld [vmem:[#allocation2 + $0x68] sm:$0xff]  ;;  %v38_v17 = vld [vmem:[#allocation2 + $0x70] sm:$0xff]  ;;  %v39_v18 = vld [vmem:[#allocation2 + $0x78] sm:$0xff] }
  0x18   :  { %v40_v19 = vld [vmem:[#allocation2 + $0x80] sm:$0xff]  ;;  %v41_v20 = vld [vmem:[#allocation2 + $0x88] sm:$0xff]  ;;  %v42_v25 = vld [vmem:[#allocation2 + $0x90] sm:$0xff]  ;;  %p154_p11 = por %p153_p10, %p152_p9 }
  0x19   :  { %v43_v26 = vld [vmem:[#allocation2 + $0x98] sm:$0xff]  ;;  %v44_v27 = vld [vmem:[#allocation2 + $0xa0] sm:$0xff]  ;;  %v45_v32 = vld [vmem:[#allocation2 + $0xa8] sm:$0xff] }
  0x1a   :  { %v46_v33 = vld [vmem:[#allocation2 + $0xb0] sm:$0xff]  ;;  %v47_v34 = vld [vmem:[#allocation2 + $0xb8] sm:$0xff]  ;;  %v48_v39 = vld [vmem:[#allocation2 + $0xc0] sm:$0xff]  ;;  %p155_p12 = pnand %p154_p11, %p148_p8 }
  0x93   :  { %v53_v14 = vpop.permute.xlu0 %52 }
  0x94   :  { %v55_v21 = vmul.f32 %v53_v14, %v24_v2  ;;  %v56_v22 = vmul.f32 %v53_v14, %v25_v3  ;;  %v57_v23 = vmul.f32 %v53_v14, %v26_v4  ;;  %v58_v24 = vmul.f32 %v53_v14, %v27_v5 }
  0x95   :  { %v59_v28 = vmul.f32 %v53_v14, %v28_v6  ;;  %v60_v29 = vmul.f32 %v53_v14, %v29_v7  ;;  %v61_v30 = vmul.f32 %v53_v14, %v30_v8  ;;  %v62_v31 = vmul.f32 %v53_v14, %v31_v9 }
  0x96   :  { %v63_v35 = vmul.f32 %v53_v14, %v32_v10  ;;  %v64_v36 = vmul.f32 %v53_v14, %v33_v11  ;;  %v65_v37 = vmul.f32 %v53_v14, %v34_v12  ;;  %v66_v38 = vmul.f32 %v53_v14, %v35_v13  ;;  %80 = vst [vmem:[#allocation5] sm:$0xff] %v55_v21 }
  0x97   :  { %81 = vst [vmem:[#allocation5 + $0x8] sm:$0xff] %v56_v22  ;;  %82 = vst [vmem:[#allocation5 + $0x10] sm:$0xff] %v57_v23  ;;  %v67_v40 = vmul.f32 %v53_v14, %v36_v15  ;;  %v68_v41 = vmul.f32 %v53_v14, %v37_v16  ;;  %v69_v42 = vmul.f32 %v53_v14, %v38_v17 }
  0x98   :  { %83 = vst [vmem:[#allocation5 + $0x18] sm:$0xff] %v58_v24  ;;  %v70_v43 = vmul.f32 %v53_v14, %v39_v18  ;;  %84 = vst [vmem:[#allocation5 + $0x20] sm:$0xff] %v59_v28  ;;  %v71_v44 = vmul.f32 %v53_v14, %v40_v19  ;;  %v72_v45 = vmul.f32 %v53_v14, %v41_v20 }
  0x99   :  { %85 = vst [vmem:[#allocation5 + $0x28] sm:$0xff] %v60_v29  ;;  %86 = vst [vmem:[#allocation5 + $0x30] sm:$0xff] %v61_v30  ;;  %v73_v46 = vmul.f32 %v53_v14, %v42_v25  ;;  %v74_v47 = vmul.f32 %v53_v14, %v43_v26  ;;  %v75_v48 = vmul.f32 %v53_v14, %v44_v27 }
  0x9a   :  { %87 = vst [vmem:[#allocation5 + $0x38] sm:$0xff] %v62_v31  ;;  %88 = vst [vmem:[#allocation5 + $0x40] sm:$0xff] %v63_v35  ;;  %v76_v49 = vmul.f32 %v53_v14, %v45_v32  ;;  %v77_v50 = vmul.f32 %v53_v14, %v46_v33  ;;  %v78_v51 = vmul.f32 %v53_v14, %v47_v34 }
  0x9b   :  { %89 = vst [vmem:[#allocation5 + $0x48] sm:$0xff] %v64_v36  ;;  %90 = vst [vmem:[#allocation5 + $0x50] sm:$0xff] %v65_v37  ;;  %v79_v52 = vmul.f32 %v53_v14, %v48_v39 }
  0x9c   :  { %91 = vst [vmem:[#allocation5 + $0x58] sm:$0xff] %v66_v38  ;;  %92 = vst [vmem:[#allocation5 + $0x60] sm:$0xff] %v67_v40 }
  0x9d   :  { %93 = vst [vmem:[#allocation5 + $0x68] sm:$0xff] %v68_v41  ;;  %94 = vst [vmem:[#allocation5 + $0x70] sm:$0xff] %v69_v42 }
  0x9e   :  { %95 = vst [vmem:[#allocation5 + $0x78] sm:$0xff] %v70_v43  ;;  %96 = vst [vmem:[#allocation5 + $0x80] sm:$0xff] %v71_v44 }
  0x9f   :  { %97 = vst [vmem:[#allocation5 + $0x88] sm:$0xff] %v72_v45  ;;  %98 = vst [vmem:[#allocation5 + $0x90] sm:$0xff] %v73_v46 }
  0xa0   :  { %99 = vst [vmem:[#allocation5 + $0x98] sm:$0xff] %v74_v47  ;;  %100 = vst [vmem:[#allocation5 + $0xa0] sm:$0xff] %v75_v48 }
  0xa1   :  { %101 = vst [vmem:[#allocation5 + $0xa8] sm:$0xff] %v76_v49  ;;  %102 = vst [vmem:[#allocation5 + $0xb0] sm:$0xff] %v77_v50 }
  0xa2   :  { %103 = vst [vmem:[#allocation5 + $0xb8] sm:$0xff] %v78_v51  ;;  %105 = vst.msk [vmem:[#allocation5 + $0xc0] sm:$0xff] %vm104_vm0, %v79_v52 }
  0xa3   :  { %158 = shalt.err (!%p155_p12)
}
  0xa4   :  { %s159_s26 = scalar_lea.hbm %s221_s2, 3200 }
  0xa5   :  { %p160_p13 = scmp.ne.s32.totalorder %s221_s2, %s159_s26  ;;  %p163_p0 = scmp.lt.u32.totalorder %s159_s26, %s221_s2 }
  0xa7   :  { %p165_p1 = pnand %p163_p0, %p160_p13 }
  0xa9   :  { %168 = shalt.err (!%p165_p1)
}
  0xaa   :  { %115 = dma.vmem_to_hbm [thread:$0]  %s113_s1, 3200, %s221_s2, [#allocation4]  }
  0xab   :  { %171 = dma.done.wait [#allocation4], 3200  }
  0xac   :  { %172 = vsyncadd [#allocation4], 4294964096 }
  0xad   :  { %119 = vsyncpa [#allocation3], 1 }
  0xae   :  { %120 = vsyncpa [#allocation4], 1 }

</bundles_post_ra>
